<compile_context>
chip_gen: v6e
topology: v6e:2x2x1
jax: 0.10.0
libtpu: 0.0.40
codegen_flags: <defaults>
</compile_context>

<pallas_src>
import functools
import math

import jax
import jax.numpy as jnp
from jax import lax
from jax.experimental import pallas as pl
from jax.experimental.pallas import tpu as pltpu

EPS = 1e-5  # GroupNorm default eps


@functools.lru_cache(maxsize=None)
def _xlu_roll_ok():
    """Probe: does pltpu.roll lower here AND match jnp.roll semantics?"""
    def kern(x_ref, o_ref):
        o_ref[...] = pltpu.roll(x_ref[...], 1, axis=0)
    try:
        x = jnp.arange(16 * 128, dtype=jnp.float32).reshape(16, 128)
        out = pl.pallas_call(
            kern, out_shape=jax.ShapeDtypeStruct((16, 128), jnp.float32))(x)
        out = jax.block_until_ready(out)
        return bool(jnp.allclose(out, jnp.roll(x, 1, axis=0)))
    except Exception:
        return False


def _temporal_block_kernel(x_ref, w1_ref, w2_ref, vec_ref, out_ref,
                           xcol1_ref, xcol2_ref, *,
                           k, d, T, bblk, cin, cout, has_ds, use_roll):
    f32 = jnp.float32
    M = bblk * T

    # Single upcast of the bf16-stored activations; reused by the im2col taps
    # and by the identity-residual path.
    x3 = x_ref[...].astype(f32)                                # (bblk, T, cin)

    # Per-channel vectors, hoisted once.
    vecs = vec_ref[...]                                        # (8, cout) f32
    b1, g1, be1, b2, g2, be2, bds = (
        vecs[i:i + 1, :].reshape(1, 1, cout) for i in range(7))

    def build_im2col(inp3, c, xcol_ref):
        """Write the k causally shifted taps (bf16) into scratch columns."""
        flat = inp3.reshape(M, c)
        if use_roll:
            t_idx = lax.broadcasted_iota(jnp.int32, (bblk, T, c), 1)
            for j in range(k):
                s = (k - 1 - j) * d                  # look-back of tap j
                if s == 0:
                    tap = flat
                elif s >= T:
                    tap = jnp.zeros_like(flat)
                else:
                    # XLU sublane rotate + one VPU select; rows with t < s are
                    # zeroed, so wrap-around across samples is harmless.
                    rolled = pltpu.roll(flat, s, axis=0).reshape(bblk, T, c)
                    tap = jnp.where(t_idx >= s, rolled, 0.0).reshape(M, c)
                xcol_ref[:, j * c:(j + 1) * c] = tap.astype(jnp.bfloat16)
        else:
            flat_bf = flat.astype(jnp.bfloat16)      # cast once, reuse k times
            for j in range(k):
                s = (k - 1 - j) * d
                lo, hi = j * c, (j + 1) * c
                if s == 0:
                    xcol_ref[:, lo:hi] = flat_bf
                elif s >= T:
                    xcol_ref[:, lo:hi] = jnp.zeros((M, c), jnp.bfloat16)
                else:
                    for b in range(bblk):            # static; bblk is small
                        r0 = b * T
                        xcol_ref[r0:r0 + s, lo:hi] = jnp.zeros(
                            (s, c), jnp.bfloat16)
                        xcol_ref[r0 + s:r0 + T, lo:hi] = (
                            flat_bf[r0:r0 + T - s, :])

    def group_norm(h3, gamma, beta):
        # GroupNorm(1, C): per-sample stats over (T, C).  Hierarchical two-pass
        # reduction (time then channels) avoids E[x^2]-E[x]^2 cancellation; the
        # affine is folded into one scale/shift pass over the tile.
        n = float(T * cout)
        mu = jnp.sum(jnp.sum(h3, axis=1, keepdims=True), axis=2,
                     keepdims=True) / n
        cen = h3 - mu
        var = jnp.sum(jnp.sum(cen * cen, axis=1, keepdims=True), axis=2,
                      keepdims=True) / n
        return cen * (gamma * lax.rsqrt(var + EPS)) + beta

    # ---- conv1 (+ folded 1x1 downsample) -> ReLU -> GroupNorm -> dropout(id)
    build_im2col(x3, cin, xcol1_ref)
    r1 = jnp.dot(xcol1_ref[...], w1_ref[...],
                 preferred_element_type=f32)         # (M, cout or 2*cout)
    h = r1[:, :cout].reshape(bblk, T, cout) + b1
    h = jnp.maximum(h, 0.0)
    h = group_norm(h, g1, be1)

    # ---- conv2 -> ReLU -> GroupNorm -> dropout(id) ----
    build_im2col(h, cout, xcol2_ref)
    y = jnp.dot(xcol2_ref[...], w2_ref[...],
                preferred_element_type=f32).reshape(bblk, T, cout) + b2
    y = jnp.maximum(y, 0.0)
    y = group_norm(y, g2, be2)

    # ---- residual (folded downsample columns, or identity) + final ReLU ----
    if has_ds:
        res = r1[:, cout:].reshape(bblk, T, cout) + bds
    else:
        res = x3
    out_ref[...] = jnp.maximum(y + res, 0.0).astype(out_ref.dtype)


def _pick_batch_block(B, T, cin, cout, k, budget_bytes=40 * 1024 * 1024):
    """Largest batch block that (a) keeps the rough VMEM estimate under budget
    and (b) leaves a grid of >= 2 steps (pipelining + v7x dual-TensorCore)."""
    per_sample = T * (2 * 2 * (2 * cin + 2 * cout)     # bf16 in/out, 2x buffered
                      + 2 * k * (cin + cout)           # bf16 im2col scratches
                      + 4 * (cin + 5 * cout))          # f32 temporaries
    best = 1
    for bb in range(1, B + 1):
        if B % bb != 0:
            continue
        if bb * per_sample > budget_bytes:
            continue
        if B >= 2 and B // bb < 2:
            continue
        best = max(best, bb)
    return best


def temporal_block(x_bf, blk, *, kernel_size, dilation, batch_block=None):
    """x_bf: (B, T, C_in) bf16 -> (B, T, C_out) bf16."""
    B, T, cin = x_bf.shape
    cout = blk["cout"]
    has_ds = blk["has_ds"]
    k, d = kernel_size, dilation
    n1 = blk["w1"].shape[1]                    # cout, or 2*cout when folded ds

    bblk = (_pick_batch_block(B, T, cin, cout, k)
            if batch_block is None else batch_block)
    assert B % bblk == 0, "batch_block must divide B"

    kern = functools.partial(
        _temporal_block_kernel, k=k, d=d, T=T, bblk=bblk, cin=cin, cout=cout,
        has_ds=has_ds, use_roll=_xlu_roll_ok())

    flops = 2 * B * T * (k * cin * n1 + k * cout * cout)
    bytes_accessed = (2 * B * T * (cin + cout)
                      + 2 * (k * cin * n1 + k * cout * cout) + 4 * 8 * cout)
    cost = pl.CostEstimate(flops=flops, transcendentals=0,
                           bytes_accessed=bytes_accessed)

    return pl.pallas_call(
        kern,
        out_shape=jax.ShapeDtypeStruct((B, T, cout), jnp.bfloat16),
        grid_spec=pltpu.PrefetchScalarGridSpec(
            num_scalar_prefetch=0,
            grid=(B // bblk,),
            in_specs=[
                pl.BlockSpec((bblk, T, cin), lambda b: (b, 0, 0)),   # act in
                pl.BlockSpec((k * cin, n1), lambda b: (0, 0)),       # w1(+ds)
                pl.BlockSpec((k * cout, cout), lambda b: (0, 0)),    # w2
                pl.BlockSpec((8, cout), lambda b: (0, 0)),           # vectors
            ],
            out_specs=pl.BlockSpec((bblk, T, cout), lambda b: (b, 0, 0)),
            scratch_shapes=[
                pltpu.VMEM((bblk * T, k * cin), jnp.bfloat16),       # im2col 1
                pltpu.VMEM((bblk * T, k * cout), jnp.bfloat16),      # im2col 2
            ],
        ),
        compiler_params=pltpu.CompilerParams(
            dimension_semantics=("parallel",),
            vmem_limit_bytes=48 * 1024 * 1024),
        cost_estimate=cost,
    )(x_bf, blk["w1"], blk["w2"], blk["vecs"])


def tcn_forward(x, params, w_out, b_out, kernel_size, pool="last"):
    """x: (B, T, input_dim) f32.  PyTorch's transpose(1,2) is implicit because
    we keep the (B, T, C) layout end-to-end."""
    h = x.astype(jnp.bfloat16)          # bf16 activations between blocks
    for i, blk in enumerate(params):
        h = temporal_block(h, blk, kernel_size=kernel_size, dilation=2 ** i)
    hf = h.astype(jnp.float32)
    pooled = jnp.mean(hf, axis=1) if pool == "avg" else hf[:, -1, :]
    # Output head in plain jnp: a (B,C)@(C,1) projection is too small to
    # amortize a Pallas launch and its lane width of 1 forces masked stores.
    return pooled @ w_out + b_out


# ---------------------------------------------------------------------------
# Parameter construction (kaiming/xavier like the PyTorch init; biases/affine
# get small random values to exercise those code paths).
# ---------------------------------------------------------------------------
def init_params(key, input_dim, num_channels, kernel_size):
    k = kernel_size
    blocks = []
    for i, cout in enumerate(num_channels):
        cin = input_dim if i == 0 else num_channels[i - 1]
        key, k1, k2, k3, k4 = jax.random.split(key, 5)
        std1 = math.sqrt(2.0 / (cin * k))       # kaiming_normal, relu
        std2 = math.sqrt(2.0 / (cout * k))
        w1 = jax.random.normal(k1, (k, cin, cout), jnp.float32) * std1
        w2 = jax.random.normal(k2, (k, cout, cout), jnp.float32) * std2
        # rows: [b1, g1, be1, b2, g2, be2, bds, pad]
        vecs = 0.1 * jax.random.normal(k4, (8, cout), jnp.float32)
        vecs = vecs.at[1].add(1.0).at[4].add(1.0).at[7].set(0.0)

        has_ds = cin != cout
        w1_flat = w1.reshape(k * cin, cout)     # rows [j*cin:(j+1)*cin] = tap j
        wds = None
        w1_packed = w1_flat
        if has_ds:
            std_ds = math.sqrt(2.0 / cin)       # kaiming on 1x1 conv
            wds = jax.random.normal(k3, (cin, cout), jnp.float32) * std_ds
            # Fold the 1x1 downsample into conv1's matmul: extra N columns that
            # are non-zero only for the unshifted tap (j = k-1).
            ds_cols = jnp.zeros((k * cin, cout), jnp.float32)
            ds_cols = ds_cols.at[(k - 1) * cin:, :].set(wds)
            w1_packed = jnp.concatenate([w1_flat, ds_cols], axis=1)

        blocks.append({
            "w1": w1_packed.astype(jnp.bfloat16),     # (k*cin, cout or 2*cout)
            "w2": w2.reshape(k * cout, cout).astype(jnp.bfloat16),
            "vecs": vecs,
            "has_ds": has_ds,
            "cout": cout,
            # unfolded copies for the independent pure-JAX reference:
            "w1_ref": w1_flat.astype(jnp.bfloat16),
            "wds": None if wds is None else wds.astype(jnp.bfloat16),
        })

    key, kw = jax.random.split(key)
    c_last = num_channels[-1]
    bound = math.sqrt(6.0 / (c_last + 1))              # xavier_uniform
    w_out = jax.random.uniform(kw, (c_last, 1), jnp.float32, -bound, bound)
    b_out = jnp.zeros((1,), jnp.float32)
    return blocks, w_out, b_out


# ---------------------------------------------------------------------------
# Pure-JAX reference (same math, incl. bf16 matmul operands and bf16 activation
# storage between blocks, but UNFOLDED downsample) — independent sanity check.
# ---------------------------------------------------------------------------
def _ref_block(x_bf, blk, k, d):
    B, T, cin = x_bf.shape
    cout = blk["cout"]
    v = blk["vecs"]
    x3 = x_bf.astype(jnp.float32)

    def row(i):
        return v[i].reshape(1, 1, cout)

    def causal_im2col(inp_f32):
        parts = []
        for j in range(k):
            s = (k - 1 - j) * d
            if s == 0:
                parts.append(inp_f32)
            elif s >= T:
                parts.append(jnp.zeros_like(inp_f32))
            else:
                parts.append(jnp.pad(inp_f32[:, :T - s, :],
                                     ((0, 0), (s, 0), (0, 0))))
        return jnp.concatenate(parts, axis=-1).astype(jnp.bfloat16)

    def gn(h, g, be):
        mu = jnp.mean(h, axis=(1, 2), keepdims=True)
        var = jnp.mean((h - mu) ** 2, axis=(1, 2), keepdims=True)
        return (h - mu) / jnp.sqrt(var + EPS) * g + be

    h = jnp.einsum("btc,cd->btd", causal_im2col(x3), blk["w1_ref"],
                   preferred_element_type=jnp.float32) + row(0)
    h = jnp.maximum(h, 0.0)
    h = gn(h, row(1), row(2))
    y = jnp.einsum("btc,cd->btd", causal_im2col(h), blk["w2"],
                   preferred_element_type=jnp.float32) + row(3)
    y = jnp.maximum(y, 0.0)
    y = gn(y, row(4), row(5))
    if blk["has_ds"]:
        res = jnp.einsum("btc,cd->btd", x_bf, blk["wds"],
                         preferred_element_type=jnp.float32) + row(6)
    else:
        res = x3
    return jnp.maximum(y + res, 0.0).astype(jnp.bfloat16)


def tcn_reference(x, params, w_out, b_out, kernel_size, pool="last"):
    h = x.astype(jnp.bfloat16)
    for i, blk in enumerate(params):
        h = _ref_block(h, blk, kernel_size, 2 ** i)
    hf = h.astype(jnp.float32)
    pooled = jnp.mean(hf, axis=1) if pool == "avg" else hf[:, -1, :]
    return pooled @ w_out + b_out


if __name__ == "__main__":
    B, T, INPUT_DIM = 2, 16, 8
    # 64/128-wide channels keep lanes reasonably dense; block 1 has
    # cin == cout so the identity-residual path is exercised too.
    NUM_CHANNELS = [64, 64, 128]
    KERNEL_SIZE = 3

    key = jax.random.PRNGKey(0)
    key, kx = jax.random.split(key)
    x = jax.random.normal(kx, (B, T, INPUT_DIM), jnp.float32)

    params, w_out, b_out = init_params(key, INPUT_DIM, NUM_CHANNELS,
                                       KERNEL_SIZE)

    out = tcn_forward(x, params, w_out, b_out, KERNEL_SIZE, pool="last")
    out = jax.block_until_ready(out)
    ref = tcn_reference(x, params, w_out, b_out, KERNEL_SIZE, pool="last")
    assert out.shape == (B, 1), out.shape
    assert jnp.allclose(out, ref, atol=3e-2, rtol=3e-2), (out, ref)

    out_avg = jax.block_until_ready(
        tcn_forward(x, params, w_out, b_out, KERNEL_SIZE, pool="avg"))
    ref_avg = tcn_reference(x, params, w_out, b_out, KERNEL_SIZE, pool="avg")
    assert jnp.allclose(out_avg, ref_avg, atol=3e-2, rtol=3e-2), (out_avg,
                                                                  ref_avg)

    print("KERNEL_OK")
</pallas_src>

<mosaic_0001>
module attributes {stable_mosaic.version = 11 : i64} {
  func.func @kern(%arg0: memref<16x128xf32, #tpu.memory_space<vmem>>, %arg1: memref<16x128xf32, #tpu.memory_space<vmem>>) attributes {dimension_semantics = [], scalar_prefetch = 0 : i64, scratch_operands = 0 : i64, tpu.core_type = #tpu.core_type<tc>} {
    %c0 = arith.constant 0 : index
    %c0_0 = arith.constant 0 : index
    %0 = vector.load %arg0[%c0, %c0_0] : memref<16x128xf32, #tpu.memory_space<vmem>>, vector<16x128xf32>
    %c1_i32 = arith.constant 1 : i32
    %1 = tpu.dynamic_rotate %0 by %c1_i32 dim 0 : vector<16x128xf32>, i32 -> vector<16x128xf32>
    %c0_1 = arith.constant 0 : index
    %c0_2 = arith.constant 0 : index
    %2 = vector.load %arg1[%c0_1, %c0_2] : memref<16x128xf32, #tpu.memory_space<vmem>>, vector<16x128xf32>
    tpu.vector_store %arg1[%c0_1, %c0_2], %1 {strides = array<i32>} : memref<16x128xf32, #tpu.memory_space<vmem>>, vector<16x128xf32>,
    return
  }
}

module attributes {stable_mosaic.version = 11 : i64} {
  func.func @_temporal_block_kernel(%arg0: i32, %arg1: memref<1x16x8xbf16, #tpu.memory_space<vmem>>, %arg2: memref<24x128xbf16, #tpu.memory_space<vmem>>, %arg3: memref<192x64xbf16, #tpu.memory_space<vmem>>, %arg4: memref<8x64xf32, #tpu.memory_space<vmem>>, %arg5: memref<1x16x64xbf16, #tpu.memory_space<vmem>>, %arg6: memref<16x24xbf16, #tpu.memory_space<vmem>>, %arg7: memref<16x192xbf16, #tpu.memory_space<vmem>>) attributes {dimension_semantics = [#tpu.dimension_semantics<parallel>], iteration_bounds = array<i64: 2>, scalar_prefetch = 0 : i64, scratch_operands = 2 : i64, tpu.core_type = #tpu.core_type<tc>, window_params = [{transform_indices = @transform_0, window_bounds = array<i64: 1, 16, 8>}, {pipeline_mode = #tpu.pipeline_mode<synchronous>, transform_indices = @transform_1, window_bounds = array<i64: 24, 128>}, {pipeline_mode = #tpu.pipeline_mode<synchronous>, transform_indices = @transform_2, window_bounds = array<i64: 192, 64>}, {pipeline_mode = #tpu.pipeline_mode<synchronous>, transform_indices = @transform_3, window_bounds = array<i64: 8, 64>}, {transform_indices = @transform_4, window_bounds = array<i64: 1, 16, 64>}]} {
    %c0 = arith.constant 0 : index
    %c0_0 = arith.constant 0 : index
    %c0_1 = arith.constant 0 : index
    %0 = vector.load %arg1[%c0, %c0_0, %c0_1] : memref<1x16x8xbf16, #tpu.memory_space<vmem>>, vector<1x16x8xbf16>
    %1 = arith.extf %0 : vector<1x16x8xbf16> to vector<1x16x8xf32>
    %c0_2 = arith.constant 0 : index
    %c0_3 = arith.constant 0 : index
    %2 = vector.load %arg4[%c0_2, %c0_3] : memref<8x64xf32, #tpu.memory_space<vmem>>, vector<8x64xf32>
    %3 = vector.extract_strided_slice %2 {offsets = [0, 0], sizes = [1, 64], strides = [1, 1]} : vector<8x64xf32> to vector<1x64xf32>
    %4 = vector.shape_cast %3 : vector<1x64xf32> to vector<1x1x64xf32>
    %5 = vector.extract_strided_slice %2 {offsets = [1, 0], sizes = [1, 64], strides = [1, 1]} : vector<8x64xf32> to vector<1x64xf32>
    %6 = vector.shape_cast %5 : vector<1x64xf32> to vector<1x1x64xf32>
    %7 = vector.extract_strided_slice %2 {offsets = [2, 0], sizes = [1, 64], strides = [1, 1]} : vector<8x64xf32> to vector<1x64xf32>
    %8 = vector.shape_cast %7 : vector<1x64xf32> to vector<1x1x64xf32>
    %9 = vector.extract_strided_slice %2 {offsets = [3, 0], sizes = [1, 64], strides = [1, 1]} : vector<8x64xf32> to vector<1x64xf32>
    %10 = vector.shape_cast %9 : vector<1x64xf32> to vector<1x1x64xf32>
    %11 = vector.extract_strided_slice %2 {offsets = [4, 0], sizes = [1, 64], strides = [1, 1]} : vector<8x64xf32> to vector<1x64xf32>
    %12 = vector.shape_cast %11 : vector<1x64xf32> to vector<1x1x64xf32>
    %13 = vector.extract_strided_slice %2 {offsets = [5, 0], sizes = [1, 64], strides = [1, 1]} : vector<8x64xf32> to vector<1x64xf32>
    %14 = vector.shape_cast %13 : vector<1x64xf32> to vector<1x1x64xf32>
    %15 = vector.extract_strided_slice %2 {offsets = [6, 0], sizes = [1, 64], strides = [1, 1]} : vector<8x64xf32> to vector<1x64xf32>
    %16 = vector.shape_cast %15 : vector<1x64xf32> to vector<1x1x64xf32>
    %17 = vector.shape_cast %1 : vector<1x16x8xf32> to vector<16x8xf32>
    %18 = arith.truncf %17 : vector<16x8xf32> to vector<16x8xbf16>
    %cst = arith.constant 0.000000e+00 : bf16
    %19 = vector.broadcast %cst : bf16 to vector<2x8xbf16>
    %c0_4 = arith.constant 0 : index
    %c0_5 = arith.constant 0 : index
    %20 = vector.load %arg6[%c0_4, %c0_5] : memref<16x24xbf16, #tpu.memory_space<vmem>>, vector<2x8xbf16>
    tpu.vector_store %arg6[%c0_4, %c0_5], %19 {strides = array<i32>} : memref<16x24xbf16, #tpu.memory_space<vmem>>, vector<2x8xbf16>,
    %21 = vector.extract_strided_slice %18 {offsets = [0, 0], sizes = [14, 8], strides = [1, 1]} : vector<16x8xbf16> to vector<14x8xbf16>
    %c2 = arith.constant 2 : index
    %c0_6 = arith.constant 0 : index
    %22 = vector.load %arg6[%c2, %c0_6] : memref<16x24xbf16, #tpu.memory_space<vmem>>, vector<14x8xbf16>
    tpu.vector_store %arg6[%c2, %c0_6], %21 {strides = array<i32>} : memref<16x24xbf16, #tpu.memory_space<vmem>>, vector<14x8xbf16>,
    %cst_7 = arith.constant 0.000000e+00 : bf16
    %23 = vector.broadcast %cst_7 : bf16 to vector<1x8xbf16>
    %c0_8 = arith.constant 0 : index
    %c8 = arith.constant 8 : index
    %24 = vector.load %arg6[%c0_8, %c8] : memref<16x24xbf16, #tpu.memory_space<vmem>>, vector<1x8xbf16>
    tpu.vector_store %arg6[%c0_8, %c8], %23 {strides = array<i32>} : memref<16x24xbf16, #tpu.memory_space<vmem>>, vector<1x8xbf16>,
    %25 = vector.extract_strided_slice %18 {offsets = [0, 0], sizes = [15, 8], strides = [1, 1]} : vector<16x8xbf16> to vector<15x8xbf16>
    %c1 = arith.constant 1 : index
    %c8_9 = arith.constant 8 : index
    %26 = vector.load %arg6[%c1, %c8_9] : memref<16x24xbf16, #tpu.memory_space<vmem>>, vector<15x8xbf16>
    tpu.vector_store %arg6[%c1, %c8_9], %25 {strides = array<i32>} : memref<16x24xbf16, #tpu.memory_space<vmem>>, vector<15x8xbf16>,
    %c0_10 = arith.constant 0 : index
    %c16 = arith.constant 16 : index
    %27 = vector.load %arg6[%c0_10, %c16] : memref<16x24xbf16, #tpu.memory_space<vmem>>, vector<16x8xbf16>
    tpu.vector_store %arg6[%c0_10, %c16], %18 {strides = array<i32>} : memref<16x24xbf16, #tpu.memory_space<vmem>>, vector<16x8xbf16>,
    %c0_11 = arith.constant 0 : index
    %c0_12 = arith.constant 0 : index
    %28 = vector.load %arg6[%c0_11, %c0_12] : memref<16x24xbf16, #tpu.memory_space<vmem>>, vector<16x24xbf16>
    %c0_13 = arith.constant 0 : index
    %c0_14 = arith.constant 0 : index
    %29 = vector.load %arg2[%c0_13, %c0_14] : memref<24x128xbf16, #tpu.memory_space<vmem>>, vector<24x128xbf16>
    %cst_15 = arith.constant dense<0.000000e+00> : vector<16x128xf32>
    %30 = tpu.matmul %28, %29, %cst_15 {dimension_numbers = #tpu.dot_dimension_numbers<[1], [0], [0], [1], [0, 0, 1, 1], [], []>} : vector<16x24xbf16>, vector<24x128xbf16>, vector<16x128xf32> -> vector<16x128xf32>
    %31 = vector.extract_strided_slice %30 {offsets = [0, 0], sizes = [16, 64], strides = [1, 1]} : vector<16x128xf32> to vector<16x64xf32>
    %32 = vector.shape_cast %31 : vector<16x64xf32> to vector<1x16x64xf32>
    %33 = vector.broadcast %4 : vector<1x1x64xf32> to vector<1x16x64xf32>
    %34 = arith.addf %32, %33 : vector<1x16x64xf32>
    %cst_16 = arith.constant 0.000000e+00 : f32
    %35 = vector.broadcast %cst_16 : f32 to vector<1x16x64xf32>
    %36 = arith.maximumf %34, %35 : vector<1x16x64xf32>
    %cst_17 = arith.constant dense<0.000000e+00> : vector<1x64xf32>
    %37 = vector.multi_reduction <add>, %36, %cst_17 [1] : vector<1x16x64xf32> to vector<1x64xf32>
    %38 = vector.shape_cast %37 : vector<1x64xf32> to vector<1x1x64xf32>
    %cst_18 = arith.constant dense<0.000000e+00> : vector<1x1xf32>
    %39 = vector.multi_reduction <add>, %38, %cst_18 [2] : vector<1x1x64xf32> to vector<1x1xf32>
    %40 = vector.shape_cast %39 : vector<1x1xf32> to vector<1x1x1xf32>
    %cst_19 = arith.constant 1.024000e+03 : f32
    %41 = vector.broadcast %cst_19 : f32 to vector<1x1x1xf32>
    %42 = arith.divf %40, %41 : vector<1x1x1xf32>
    %43 = vector.broadcast %42 : vector<1x1x1xf32> to vector<1x16x64xf32>
    %44 = arith.subf %36, %43 : vector<1x16x64xf32>
    %45 = arith.mulf %44, %44 : vector<1x16x64xf32>
    %cst_20 = arith.constant dense<0.000000e+00> : vector<1x64xf32>
    %46 = vector.multi_reduction <add>, %45, %cst_20 [1] : vector<1x16x64xf32> to vector<1x64xf32>
    %47 = vector.shape_cast %46 : vector<1x64xf32> to vector<1x1x64xf32>
    %cst_21 = arith.constant dense<0.000000e+00> : vector<1x1xf32>
    %48 = vector.multi_reduction <add>, %47, %cst_21 [2] : vector<1x1x64xf32> to vector<1x1xf32>
    %49 = vector.shape_cast %48 : vector<1x1xf32> to vector<1x1x1xf32>
    %cst_22 = arith.constant 1.024000e+03 : f32
    %50 = vector.broadcast %cst_22 : f32 to vector<1x1x1xf32>
    %51 = arith.divf %49, %50 : vector<1x1x1xf32>
    %cst_23 = arith.constant 9.99999974E-6 : f32
    %52 = vector.broadcast %cst_23 : f32 to vector<1x1x1xf32>
    %53 = arith.addf %51, %52 : vector<1x1x1xf32>
    %54 = math.rsqrt %53 : vector<1x1x1xf32>
    %55 = vector.broadcast %54 : vector<1x1x1xf32> to vector<1x1x64xf32>
    %56 = arith.mulf %6, %55 : vector<1x1x64xf32>
    %57 = vector.broadcast %56 : vector<1x1x64xf32> to vector<1x16x64xf32>
    %58 = arith.mulf %44, %57 : vector<1x16x64xf32>
    %59 = vector.broadcast %8 : vector<1x1x64xf32> to vector<1x16x64xf32>
    %60 = arith.addf %58, %59 : vector<1x16x64xf32>
    %61 = vector.shape_cast %60 : vector<1x16x64xf32> to vector<16x64xf32>
    %62 = arith.truncf %61 : vector<16x64xf32> to vector<16x64xbf16>
    %cst_24 = arith.constant 0.000000e+00 : bf16
    %63 = vector.broadcast %cst_24 : bf16 to vector<2x64xbf16>
    %c0_25 = arith.constant 0 : index
    %c0_26 = arith.constant 0 : index
    %64 = vector.load %arg7[%c0_25, %c0_26] : memref<16x192xbf16, #tpu.memory_space<vmem>>, vector<2x64xbf16>
    tpu.vector_store %arg7[%c0_25, %c0_26], %63 {strides = array<i32>} : memref<16x192xbf16, #tpu.memory_space<vmem>>, vector<2x64xbf16>,
    %65 = vector.extract_strided_slice %62 {offsets = [0, 0], sizes = [14, 64], strides = [1, 1]} : vector<16x64xbf16> to vector<14x64xbf16>
    %c2_27 = arith.constant 2 : index
    %c0_28 = arith.constant 0 : index
    %66 = vector.load %arg7[%c2_27, %c0_28] : memref<16x192xbf16, #tpu.memory_space<vmem>>, vector<14x64xbf16>
    tpu.vector_store %arg7[%c2_27, %c0_28], %65 {strides = array<i32>} : memref<16x192xbf16, #tpu.memory_space<vmem>>, vector<14x64xbf16>,
    %cst_29 = arith.constant 0.000000e+00 : bf16
    %67 = vector.broadcast %cst_29 : bf16 to vector<1x64xbf16>
    %c0_30 = arith.constant 0 : index
    %c64 = arith.constant 64 : index
    %68 = vector.load %arg7[%c0_30, %c64] : memref<16x192xbf16, #tpu.memory_space<vmem>>, vector<1x64xbf16>
    tpu.vector_store %arg7[%c0_30, %c64], %67 {strides = array<i32>} : memref<16x192xbf16, #tpu.memory_space<vmem>>, vector<1x64xbf16>,
    %69 = vector.extract_strided_slice %62 {offsets = [0, 0], sizes = [15, 64], strides = [1, 1]} : vector<16x64xbf16> to vector<15x64xbf16>
    %c1_31 = arith.constant 1 : index
    %c64_32 = arith.constant 64 : index
    %70 = vector.load %arg7[%c1_31, %c64_32] : memref<16x192xbf16, #tpu.memory_space<vmem>>, vector<15x64xbf16>
    tpu.vector_store %arg7[%c1_31, %c64_32], %69 {strides = array<i32>} : memref<16x192xbf16, #tpu.memory_space<vmem>>, vector<15x64xbf16>,
    %c0_33 = arith.constant 0 : index
    %c128 = arith.constant 128 : index
    %71 = vector.load %arg7[%c0_33, %c128] : memref<16x192xbf16, #tpu.memory_space<vmem>>, vector<16x64xbf16>
    tpu.vector_store %arg7[%c0_33, %c128], %62 {strides = array<i32>} : memref<16x192xbf16, #tpu.memory_space<vmem>>, vector<16x64xbf16>,
    %c0_34 = arith.constant 0 : index
    %c0_35 = arith.constant 0 : index
    %72 = vector.load %arg7[%c0_34, %c0_35] : memref<16x192xbf16, #tpu.memory_space<vmem>>, vector<16x192xbf16>
    %c0_36 = arith.constant 0 : index
    %c0_37 = arith.constant 0 : index
    %73 = vector.load %arg3[%c0_36, %c0_37] : memref<192x64xbf16, #tpu.memory_space<vmem>>, vector<192x64xbf16>
    %cst_38 = arith.constant dense<0.000000e+00> : vector<16x64xf32>
    %74 = tpu.matmul %72, %73, %cst_38 {dimension_numbers = #tpu.dot_dimension_numbers<[1], [0], [0], [1], [0, 0, 1, 1], [], []>} : vector<16x192xbf16>, vector<192x64xbf16>, vector<16x64xf32> -> vector<16x64xf32>
    %75 = vector.shape_cast %74 : vector<16x64xf32> to vector<1x16x64xf32>
    %76 = vector.broadcast %10 : vector<1x1x64xf32> to vector<1x16x64xf32>
    %77 = arith.addf %75, %76 : vector<1x16x64xf32>
    %cst_39 = arith.constant 0.000000e+00 : f32
    %78 = vector.broadcast %cst_39 : f32 to vector<1x16x64xf32>
    %79 = arith.maximumf %77, %78 : vector<1x16x64xf32>
    %cst_40 = arith.constant dense<0.000000e+00> : vector<1x64xf32>
    %80 = vector.multi_reduction <add>, %79, %cst_40 [1] : vector<1x16x64xf32> to vector<1x64xf32>
    %81 = vector.shape_cast %80 : vector<1x64xf32> to vector<1x1x64xf32>
    %cst_41 = arith.constant dense<0.000000e+00> : vector<1x1xf32>
    %82 = vector.multi_reduction <add>, %81, %cst_41 [2] : vector<1x1x64xf32> to vector<1x1xf32>
    %83 = vector.shape_cast %82 : vector<1x1xf32> to vector<1x1x1xf32>
    %cst_42 = arith.constant 1.024000e+03 : f32
    %84 = vector.broadcast %cst_42 : f32 to vector<1x1x1xf32>
    %85 = arith.divf %83, %84 : vector<1x1x1xf32>
    %86 = vector.broadcast %85 : vector<1x1x1xf32> to vector<1x16x64xf32>
    %87 = arith.subf %79, %86 : vector<1x16x64xf32>
    %88 = arith.mulf %87, %87 : vector<1x16x64xf32>
    %cst_43 = arith.constant dense<0.000000e+00> : vector<1x64xf32>
    %89 = vector.multi_reduction <add>, %88, %cst_43 [1] : vector<1x16x64xf32> to vector<1x64xf32>
    %90 = vector.shape_cast %89 : vector<1x64xf32> to vector<1x1x64xf32>
    %cst_44 = arith.constant dense<0.000000e+00> : vector<1x1xf32>
    %91 = vector.multi_reduction <add>, %90, %cst_44 [2] : vector<1x1x64xf32> to vector<1x1xf32>
    %92 = vector.shape_cast %91 : vector<1x1xf32> to vector<1x1x1xf32>
    %cst_45 = arith.constant 1.024000e+03 : f32
    %93 = vector.broadcast %cst_45 : f32 to vector<1x1x1xf32>
    %94 = arith.divf %92, %93 : vector<1x1x1xf32>
    %cst_46 = arith.constant 9.99999974E-6 : f32
    %95 = vector.broadcast %cst_46 : f32 to vector<1x1x1xf32>
    %96 = arith.addf %94, %95 : vector<1x1x1xf32>
    %97 = math.rsqrt %96 : vector<1x1x1xf32>
    %98 = vector.broadcast %97 : vector<1x1x1xf32> to vector<1x1x64xf32>
    %99 = arith.mulf %12, %98 : vector<1x1x64xf32>
    %100 = vector.broadcast %99 : vector<1x1x64xf32> to vector<1x16x64xf32>
    %101 = arith.mulf %87, %100 : vector<1x16x64xf32>
    %102 = vector.broadcast %14 : vector<1x1x64xf32> to vector<1x16x64xf32>
    %103 = arith.addf %101, %102 : vector<1x16x64xf32>
    %104 = vector.extract_strided_slice %30 {offsets = [0, 64], sizes = [16, 64], strides = [1, 1]} : vector<16x128xf32> to vector<16x64xf32>
    %105 = vector.shape_cast %104 : vector<16x64xf32> to vector<1x16x64xf32>
    %106 = vector.broadcast %16 : vector<1x1x64xf32> to vector<1x16x64xf32>
    %107 = arith.addf %105, %106 : vector<1x16x64xf32>
    %108 = arith.addf %103, %107 : vector<1x16x64xf32>
    %cst_47 = arith.constant 0.000000e+00 : f32
    %109 = vector.broadcast %cst_47 : f32 to vector<1x16x64xf32>
    %110 = arith.maximumf %108, %109 : vector<1x16x64xf32>
    %111 = arith.truncf %110 : vector<1x16x64xf32> to vector<1x16x64xbf16>
    %c0_48 = arith.constant 0 : index
    %c0_49 = arith.constant 0 : index
    %c0_50 = arith.constant 0 : index
    %112 = vector.load %arg5[%c0_48, %c0_49, %c0_50] : memref<1x16x64xbf16, #tpu.memory_space<vmem>>, vector<1x16x64xbf16>
    tpu.vector_store %arg5[%c0_48, %c0_49, %c0_50], %111 {strides = array<i32>} : memref<1x16x64xbf16, #tpu.memory_space<vmem>>, vector<1x16x64xbf16>,
    return
  }
  func.func @transform_0(%arg0: i32) -> (i32, i32, i32) {
    %c0_i32 = arith.constant 0 : i32
    %c0_i32_0 = arith.constant 0 : i32
    %c0_i32_1 = arith.constant 0 : i32
    return %arg0, %c0_i32, %c0_i32_0 : i32, i32, i32
  }
  func.func @transform_1(%arg0: i32) -> (i32, i32) {
    %c0_i32 = arith.constant 0 : i32
    %c0_i32_0 = arith.constant 0 : i32
    %c0_i32_1 = arith.constant 0 : i32
    return %c0_i32, %c0_i32_0 : i32, i32
  }
  func.func @transform_2(%arg0: i32) -> (i32, i32) {
    %c0_i32 = arith.constant 0 : i32
    %c0_i32_0 = arith.constant 0 : i32
    %c0_i32_1 = arith.constant 0 : i32
    return %c0_i32, %c0_i32_0 : i32, i32
  }
  func.func @transform_3(%arg0: i32) -> (i32, i32) {
    %c0_i32 = arith.constant 0 : i32
    %c0_i32_0 = arith.constant 0 : i32
    %c0_i32_1 = arith.constant 0 : i32
    return %c0_i32, %c0_i32_0 : i32, i32
  }
  func.func @transform_4(%arg0: i32) -> (i32, i32, i32) {
    %c0_i32 = arith.constant 0 : i32
    %c0_i32_0 = arith.constant 0 : i32
    %c0_i32_1 = arith.constant 0 : i32
    return %arg0, %c0_i32, %c0_i32_0 : i32, i32, i32
  }
}

</mosaic_0001>

<bundles_post_ra>
// kernel: tpu_custom_call.1
= control target key start
LH: loop header
LB: loop body
LE: loop exit
PB: predicated region body
PF: predicated region fallthrough
CT: control target
= control target key end

     0   :  { %6 = vsyncpa [#allocation3], 0  ;;  %s119_s0 = inlined_call_operand.hbm [shape: f32[16,128], index: 0, kind: input, shape index: {}]   ;;  %s120_s1 = inlined_call_operand.hbm [shape: f32[16,128], index: 1, kind: output, shape index: {}]  }
   0x1   :  { %7 = vsyncpa [#allocation4], 0  ;;  %s99_s6 = smov [#allocation2]  }
   0x2   :  { %s13_s7 = sshll.u32 %s99_s6, 4  ;;  %s14_s7 = int_to_ptr.vmem [resolvable:$true] %s13_s7 }
   0x3   :  { %s63_s8 = scalar_lea.vmem %s14_s7, 256  ;;  %p68_p1 = scmp.lt.s32.totalorder %s14_s7, %s14_s7 }
   0x4   :  { %p64_p0 = scmp.ne.s32.totalorder %s14_s7, %s63_s8  ;;  %p69_p2 = scmp.lt.s32.totalorder %s63_s8, %s63_s8 }
   0x6   :  { %p70_p3 = por %p69_p2, %p68_p1 }
   0x8   :  { %p71_p4 = pnand %p70_p3, %p64_p0 }
   0xa   :  { %74 = shalt.err (!%p71_p4)
}
   0xb   :  { %s100_s9 = smov 128   ;;  %s101_s10 = smov 8  }
   0xc   :  { %19 = dma.hbm_to_vmem [thread:$0]  %s119_s0, 256, %s14_s7, [#allocation3], %s100_s9, %s100_s9, %s101_s10  }
   0xd   :  { %95 = dma.done.wait [#allocation3], 256  }
   0xe   :  { %96 = vsyncadd [#allocation3], 4294967040  ;;  %v27_v0 = vlaneseq  ;;  %s102_s13 = smov [#allocation5]   ;;  %v23_v2 = vld [vmem:[#allocation2] sm:$0xff]  ;;  %v24_v3 = vld [vmem:[#allocation2 + $0x8] sm:$0xff] }
   0xf   :  { %s39_s14 = sshll.u32 %s102_s13, 4  ;;  %v25_v4 = vrot.slane %v23_v2, 7  ;;  %v26_v5 = vrot.slane %v24_v3, 7  ;;  %s40_s14 = int_to_ptr.vmem [resolvable:$true] %s39_s14 }
  0x10   :  { %v28_v1 = vshrl.u32 %v27_v0, 7  ;;  %s75_s15 = scalar_lea.vmem %s40_s14, 256  ;;  %p80_p6 = scmp.lt.s32.totalorder %s40_s14, %s40_s14 }
  0x11   :  { %p76_p5 = scmp.ne.s32.totalorder %s40_s14, %s75_s15  ;;  %p81_p7 = scmp.lt.s32.totalorder %s75_s15, %s75_s15 }
  0x12   :  { %vm29_vm0 = vcmp.lt.s32.totalorder %v28_v1, 1 }
  0x13   :  { %v31_v6 = vsel %vm29_vm0, %v26_v5, %v25_v4  ;;  %v30_v7 = vsel %vm29_vm0, %v25_v4, %v26_v5  ;;  %p82_p8 = por %p81_p7, %p80_p6 }
  0x14   :  { %32 = vst [vmem:[#allocation5] sm:$0xff] %v31_v6  ;;  %33 = vst [vmem:[#allocation5 + $0x8] sm:$0xff] %v30_v7 }
  0x15   :  { %p83_p9 = pnand %p82_p8, %p76_p5 }
  0x17   :  { %86 = shalt.err (!%p83_p9)
}
  0x18   :  { %45 = dma.vmem_to_hbm [thread:$0]  %s40_s14, 256, %s120_s1, [#allocation4], %s100_s9, %s100_s9, %s101_s10  }
  0x19   :  { %97 = dma.done.wait [#allocation4], 256  }
  0x1a   :  { %98 = vsyncadd [#allocation4], 4294967040 }
  0x1b   :  { %49 = vsyncpa [#allocation3], 1 }
  0x1c   :  { %50 = vsyncpa [#allocation4], 1 }

// kernel: tpu_custom_call.1
= control target key start
LH: loop header
LB: loop body
LE: loop exit
PB: predicated region body
PF: predicated region fallthrough
CT: control target
= control target key end

     0   :  { %9 = vsyncpa [#allocation5], 0  ;;  %s1234_s0 = inlined_call_operand.vmem [shape: bf16[2,16,8], index: 0, kind: input, shape index: {}]   ;;  %s1235_s1 = inlined_call_operand.vmem [shape: bf16[24,128], index: 1, kind: input, shape index: {}]   ;;  %s1236_s2 = inlined_call_operand.vmem [shape: bf16[192,64], index: 2, kind: input, shape index: {}]   ;;  %s1237_s3 = inlined_call_operand.vmem [shape: f32[8,64], index: 3, kind: input, shape index: {}]   ;;  %s1238_s4 = inlined_call_operand.hbm [shape: bf16[2,16,64], index: 4, kind: output, shape index: {}]  }
   0x1   :  { %11 = vsyncpa [#allocation5 + $0x1], 0  ;;  %s983_s15 = smov 0   ;;  %s985_s16 = smov 0  }
   0x2   :  { %s987_s17 = smov 0   ;;  %s989_s18 = smov 0  }
   0x3 LB: > { %s1004_s19 = sadd.s32 4294967295, %s948_s18   ;;  %s761_s20 = sadd.s32 4294967294, %s948_s18   ;;  %s948_s18 = sphi %s989_s18, %s1252_s18   ;;  %s944_s17 = sphi %s987_s17, %s1251_s17   ;;  %s940_s16 = sphi %s985_s16, %s1250_s16   ;;  %s936_s15 = sphi %s983_s15, %s1249_s15  }
   0x4   : > { %s1008_s21 = sadd.s32 1, %s948_s18   ;;  %s113_s22 = sadd.s32 1, %s944_s17 }
   0x5   : > { %s110_s23 = ssub.s32 %s948_s18, %s1008_s21  ;;  %p123_p0 = scmp.ne.s32.totalorder %s944_s17, %s940_s16 }
   0x6   : > { %p111_p1 = scmp.eq.s32.totalorder %s110_s23, 0  ;;  %p124_p2 = scmp.eq.s32.totalorder %s1004_s19, 1 }
   0x7   : > { %p129_p3 = scmp.ne.s32.totalorder %s940_s16, %s936_s15  ;;  %p130_p4 = scmp.eq.s32.totalorder %s761_s20, 1 }
   0x8   : > { %s1019_s24 = scalar_select %p111_p1, %s944_s17, %s113_s22  }
   0x9   : > { %p1021_p5 = por %p124_p2, %p123_p0  ;;  %p1025_p6 = por %p130_p4, %p129_p3 }
   0xa   : > { %p764_p7 = scmp.ge.s32.totalorder %s948_s18, 1  ;;  %p165_p8 = scmp.lt.s32.totalorder %s948_s18, 3 }
   0xc   : > { %p166_p9 = pnand %p764_p7, %p165_p8 }
   0xd   : > { %p191_p10 = scmp.lt.s32.totalorder (!%p166_p9), %s1004_s19, 1  ;;  %s951_s8 = smov (!%p166_p9), 16  }
   0xe   : > { %169 = sbr.rel (%p166_p9) target bundleno = 1392 (0x570), region = 36  ;;  %s954_s11 = smov (!%p166_p9), 8  }
   0xf   : > { %s955_s30 = smov (!%p166_p9), 64   ;;  %s806_s9 = sshll.u32 (!%p166_p9), %s1004_s19, 7 }
  0x10   : > { %s1188_s12 = scalar_lea.hbm (!%p166_p9), %s1238_s4, %s806_s9  ;;  %s956_s14 = smov (!%p166_p9), [#allocation4]  }
  0x11   : > { %s892_s20 = sshll.u32 (!%p166_p9), %s956_s14, 4  ;;  %s893_s20 = int_to_ptr.vmem [resolvable:$false] %s892_s20 }
  0x12   : > { %s894_s22 = scalar_lea.vmem (!%p166_p9), %s893_s20, 256 }
  0x13   : > { %vm203_vm0 = vcmask 57344   ;;  %vm394_vm1 = vcmask 516096   ;;  %v950_v0 = vmov 0   ;;  %vm223_vm2 = vcmask 122944   ;;  %s192_s27 = scalar_select %p191_p10, %s1004_s19, 1  ;;  %v867_v21 = vld [vmem:[%s1235_s1] sm:$0xff]  }
  0x14   : > { %204 = vst.msk [vmem:[#allocation2] sm:$0x1] %vm203_vm0, %v950_v0  ;;  %559 = vmatprep.subr.bf16.mxu1 %v950_v0  ;;  %vm411_vm3 = vcmask 1040896   ;;  %vm224_vm4 = vsmask.f32 256  ;;  %vm219_vm7 = vcmask 60417   ;;  %v338_v36 = vlaneseq }
  0x15   : > { %395 = vst.msk [vmem:[#allocation3] sm:$0x1] %vm394_vm1, %v950_v0  ;;  %vm229_vm5 = vsmask.f32 4368  ;;  %s799_s28 = sshll.u32 %s192_s27, 3  ;;  %vm1037_vm6 = vmand %vm223_vm2, %vm224_vm4  ;;  %vm210_vm9 = vcmask 1040384  }
  0x16   : > { %s195_s5 = scalar_lea.vmem %s1234_s0, %s799_s28  ;;  %vm1045_vm8 = vmand %vm411_vm3, %vm224_vm4  ;;  %vm211_vm10 = vcmask 1044484   ;;  %v866_v3 = vld [vmem:[%s1235_s1 + $0x8] ss:$0 sps:$4 sm:$0xff]   ;;  %vm221_vm11 = vcmask 60416   ;;  %vm293_vm12 = vcmask 1043456   ;;  %v952_v10 = vmov 0.0  }
  0x17   : > { %v864_v4 = vld [vmem:[%s195_s5] ss:$0 sps:$4 sm:$0xff]   ;;  %v865_v5 = vld [vmem:[%s195_s5 + $0x4] ss:$0 sps:$4 sm:$0xff]   ;;  %810 = vmatprep.subr.bf16.mxu0 %v952_v10  ;;  %vm953_vm13 = vmmov 0   ;;  %vm1058_vm14 = vmor %vm210_vm9, %vm211_vm10  ;;  %v295_v19 = vsel %vm293_vm12, %v866_v3, 0 }
  0x18   : > { %v232_v6 = vshrl.u32 %v864_v4, 16  ;;  %v235_v7 = vshll.u32 %v864_v4, 16  ;;  %261 = vrot.lane.b32.xlu1 %v864_v4, %s951_s8  ;;  %v240_v12 = vshrl.u32 %v865_v5, 16  ;;  %v243_v13 = vshll.u32 %v865_v5, 16  ;;  %814 = vmatprep.mubr.msk.bf16.mxu0 %vm953_vm13, %v952_v10  ;;  %vm1068_vm15 = vmor %vm224_vm4, %vm229_vm5  ;;  %v1085_v39 = vld [vmem:[%s1237_s3] sm:$0xff]  ;;  %s188_s5 = sand.u32 1, %s940_s16  }
  0x19   : > { %v213_v16 = vrot.slane %v864_v4, 7  ;;  %v215_v18 = vrot.slane %v865_v5, 7  ;;  %811 = vmatpush3.bf16.msra.mxu0 %v295_v19  ;;  %vm253_vm0 = vcmask 126016   ;;  %vm254_vm1 = vsmask.f32 7938  ;;  %v875_v19 = vld [vmem:[%s1236_s2 + $0x8] sm:$0xff]  }
  0x1a   : > { %v234_v15 = vrot.slane %v232_v6, 7  ;;  %v242_v20 = vrot.slane %v240_v12, 7  ;;  %812 = vmatprep.subr.bf16.mxu0 %v952_v10  ;;  %vm255_vm2 = vmand %vm253_vm0, %vm254_vm1  ;;  %vm267_vm3 = vcmask 191616   ;;  %vm289_vm4 = vcmask 195584   ;;  %v869_v12 = vld [vmem:[%s1236_s2 + $0x38] sm:$0xff]   ;;  %s765_s6 = sshll.u32 %s188_s5, 3 }
  0x1b   : > { %v226_v8 = vld [vmem:[#allocation2] sm:$0x1]  ;;  %220 = vst.msk [vmem:[#allocation2] sm:$0xe] %vm219_vm7, %v213_v16  ;;  %v214_v25 = vrot.slane %v213_v16, 4  ;;  %v1079_v37 = vshrl.u32 %v338_v36, 7  ;;  %560 = vmatpush1.bf16.msra.mxu1 %v869_v12 }
  0x1c   : > { %v413_v9 = vld [vmem:[#allocation3] sm:$0x1]  ;;  %v227_v11 = vsel %vm1037_vm6, 0, %v226_v8  ;;  %v237_v22 = vor.u32 %v235_v7, %v234_v15  ;;  %v238_v23 = vrot.slane %v234_v15, 4  ;;  %263 = vrot.lane.b32.xlu1 %v865_v5, %s951_s8  ;;  %v245_v26 = vor.u32 %v243_v13, %v242_v20  ;;  %v870_v13 = vld [vmem:[%s1236_s2 + $0x30] sm:$0xff]   ;;  %561 = vmatprep.subr.bf16.mxu1 %v950_v0  ;;  %v872_v15 = vld [vmem:[%s1236_s2 + $0x20] sm:$0xff]  }
  0x1d   : > { %v414_v14 = vsel %vm1045_vm8, 0, %v413_v9  ;;  %228 = vst [vmem:[#allocation2] sm:$0x1] %v227_v11  ;;  %v216_v27 = vsel %vm1058_vm14, %v214_v25, %v215_v18  ;;  %813 = vmatpush3.bf16.msra.mxu0 %v867_v21  ;;  %v340_v38 = vsub.s32 0, %v1079_v37  ;;  %vm346_vm5 = vcmask 523264   ;;  %v873_v16 = vld [vmem:[%s1236_s2 + $0x18] sm:$0xff]  }
  0x1e   : > { %415 = vst [vmem:[#allocation3] sm:$0x1] %v414_v14  ;;  %247 = vrot.lane.b32.xlu0 %v237_v22, %s954_s11  ;;  %v246_v28 = vsel %vm1068_vm15, %v238_v23, %v245_v26  ;;  %222 = vst.msk [vmem:[#allocation2 + $0x4] sm:$0xf] %vm221_vm11, %v216_v27  ;;  %v871_v14 = vld [vmem:[%s1236_s2 + $0x28] sm:$0xff]   ;;  %v874_v18 = vld [vmem:[%s1236_s2 + $0x10] sm:$0xff]  }
  0x1f   : > { %v341_v40 = vrot.slane %v1085_v39, %v340_v38  ;;  %562 = vmatpush1.bf16.msra.mxu1 %v870_v13  ;;  %v876_v20 = vld [vmem:[%s1236_s2] sm:$0xff]   ;;  %v877_v21 = vld [vmem:[%s1236_s2 + $0x58] sm:$0xff]   ;;  %v383_v26 = vsub.s32 1, %v1079_v37  ;;  %v389_v27 = vsub.s32 2, %v1079_v37  ;;  %v879_v38 = vld [vmem:[%s1236_s2 + $0x48] sm:$0xff]   ;;  %vm409_vm6 = vcmask 519168  }
  0x20   : > { %563 = vmatprep.subr.bf16.mxu1 %v950_v0  ;;  %vm407_vm7 = vcmask 519169   ;;  %vm438_vm8 = vcmask 1043968   ;;  %s190_s7 = scalar_lea.vmem [#allocation4], %s765_s6  ;;  %s1192_s13 = scalar_lea.sflag [#allocation5], %s188_s5 }
  0x21   : > { %vm439_vm9 = vmand %vm438_vm8, %vm254_vm1  ;;  %s699_s8 = sshll.u32 %s190_s7, 4  ;;  %s1183_s8 = int_to_ptr.vmem [resolvable:$true] %s699_s8 }
  0x22   : > { %249 = vrot.lane.b32.xlu0 %v246_v28, %s954_s11  ;;  %s888_s19 = scalar_lea.vmem %s1183_s8, 128  ;;  %p895_p0 = scmp.lt.s32.totalorder %s1183_s8, %s893_s20 }
  0x23   : > { %564 = vmatpush1.bf16.msra.mxu1 %v871_v14  ;;  %p889_p11 = scmp.ne.s32.totalorder %s1183_s8, %s888_s19  ;;  %p896_p1 = scmp.lt.s32.totalorder %s894_s22, %s888_s19 }
  0x24   : > { %v256_v30 = vld [vmem:[#allocation2] sm:$0xf]  ;;  %565 = vmatprep.subr.bf16.mxu1 %v950_v0 }
  0x25   : > { %p890_p12 = pnand %p889_p11, %p1021_p5  ;;  %p897_p2 = por %p896_p1, %p895_p0 }
  0x27   : > { %566 = vmatpush1.bf16.msra.mxu1 %v872_v15  ;;  %p891_p13 = pneg %p890_p12 }
  0x28   : > { %567 = vmatprep.subr.bf16.mxu1 %v950_v0 }
  0x29   : > { %p898_p3 = pnand %p897_p2, %p891_p13 }
  0x2b   : > { %568 = vmatpush1.bf16.msra.mxu1 %v873_v16 }
  0x2c   : > { %569 = vmatprep.subr.bf16.mxu1 %v950_v0 }
  0x2f   : > { %570 = vmatpush1.bf16.msra.mxu1 %v874_v18 }
  0x30   : > { %571 = vmatprep.subr.bf16.mxu1 %v950_v0 }
  0x33   : > { %572 = vmatpush1.bf16.msra.mxu1 %v875_v19 }
  0x34   : > { %573 = vmatprep.subr.bf16.mxu1 %v950_v0 }
  0x37   : > { %574 = vmatpush1.bf16.msra.mxu1 %v876_v20 }
  0x38   : > { %583 = vmatprep.subr.bf16.mxu1 %v950_v0 }
  0x3b   : > { %584 = vmatpush2.bf16.msra.mxu1 %v877_v21 }
  0x3c   : > { %585 = vmatprep.subr.bf16.mxu1 %v950_v0 }
  0x8a   : > { %v262_v29 = vpop.permute.xlu1 %261 }
  0x8e   : > { %v264_v33 = vpop.permute.xlu1 %263 }
  0x90   : > { %v248_v31 = vpop.permute.xlu0 %247 }
  0x91   : > { %v257_v32 = vsel %vm255_vm2, %v248_v31, %v256_v30  ;;  %v390_v31 = vrot.slane %v1085_v39, %v389_v27 }
  0x92   : > { %258 = vst [vmem:[#allocation2] sm:$0xf] %v257_v32  ;;  %v878_v32 = vld [vmem:[%s1236_s2 + $0x50] sm:$0xff]  }
  0x93   : > { %268 = vst.msk [vmem:[#allocation2] sm:$0xf] %vm267_vm3, %v262_v29  ;;  %586 = vmatpush2.bf16.msra.mxu1 %v878_v32 }
  0x94   : > { %v250_v34 = vpop.permute.xlu0 %249  ;;  %587 = vmatprep.subr.bf16.mxu1 %v950_v0 }
  0x95   : > { %260 = vst.msk [vmem:[#allocation2 + $0x4] sm:$0xf] %vm253_vm0, %v250_v34 }
  0x96   : > { %269 = vst.msk [vmem:[#allocation2 + $0x4] sm:$0xf] %vm267_vm3, %v264_v33 }
  0x97   : > { %588 = vmatpush2.bf16.msra.mxu1 %v879_v38 }
  0x98   : > { %589 = vmatprep.subr.bf16.mxu1 %v950_v0 }
  0x9d   : > { %v868_v35 = vld [vmem:[#allocation2] sm:$0xff]  }
  0x9e   : > { %815 = vmatmul.mubr.msk.bf16.vlgmr.msra.gmra.mxu0 %vm289_vm4, %v868_v35 }
 0x15e   : > { %v1088_v41 = vpop.f32.mrf.mxu0 }
 0x15f   : > { %v342_v42 = vadd.f32 %v341_v40, %v1088_v41 }
 0x160   : > { %v816_v43 = vpop.f32.mrf.mxu0 }
 0x161   : > { %v344_v45 = vmax.f32 %v342_v42, 0.0  ;;  %v880_v43 = vld [vmem:[%s1236_s2 + $0x40] sm:$0xff]  }
 0x162   : > { %v1091_v44 = vpop.f32.mrf.mxu0  ;;  %590 = vmatpush2.bf16.msra.mxu1 %v880_v43 }
 0x163   : > { %v343_v46 = vadd.f32 %v341_v40, %v1091_v44  ;;  %v347_v49 = vsel %vm346_vm5, %v344_v45, 0.0 }
 0x164   : > { %v817_v47 = vpop.f32.mrf.mxu0 }
 0x165   : > { %v345_v48 = vmax.f32 %v343_v46, 0.0 }
 0x167   : > { %v348_v50 = vsel %vm346_vm5, %v345_v48, 0.0 }
 0x168   : > { %v349_v51 = vadd.f32 %v348_v50, %v347_v49 }
 0x16a   : > { %v350_v52 = vrot.slane %v349_v51, 4 }
 0x16c   : > { %v351_v53 = vadd.f32 %v350_v52, %v349_v51  ;;  %v655_v52 = vsub.s32 6, %v1079_v37 }
 0x16e   : > { %v352_v54 = vrot.slane %v351_v53, 2 }
 0x170   : > { %v353_v55 = vadd.f32 %v352_v54, %v351_v53 }
 0x172   : > { %v354_v56 = vrot.slane %v353_v55, 1 }
 0x174   : > { %v355_v57 = vadd.f32 %v354_v56, %v353_v55 }
 0x176   : > { %v356_v58 = vsel %vm346_vm5, %v355_v57, 0.0 }
 0x177   : > { %357 = vadd.xlane.f32.xlu0 %v356_v58 }
 0x200   : > { %v358_v59 = vpop.xlane.xlu0 %357 }
 0x201   : > { %v360_v60 = vmul.f32 0.0009765625, %v358_v59  ;;  %v656_v59 = vrot.slane %v1085_v39, %v655_v52 }
 0x203   : > { %v361_v61 = vsub.f32 %v344_v45, %v360_v60  ;;  %v362_v62 = vsub.f32 %v345_v48, %v360_v60 }
 0x205   : > { %v363_v63 = vmul.f32 %v361_v61, %v361_v61  ;;  %v364_v1 = vmul.f32 %v362_v62, %v362_v62 }
 0x207   : > { %v365_v2 = vsel %vm346_vm5, %v363_v63, 0.0  ;;  %v366_v3 = vsel %vm346_vm5, %v364_v1, 0.0  ;;  %v602_v1 = vsub.s32 3, %v1079_v37 }
 0x208   : > { %v367_v4 = vadd.f32 %v366_v3, %v365_v2 }
 0x209   : > { %v603_v2 = vrot.slane %v1085_v39, %v602_v1 }
 0x20a   : > { %v368_v5 = vrot.slane %v367_v4, 4 }
 0x20c   : > { %v369_v6 = vadd.f32 %v368_v5, %v367_v4 }
 0x20e   : > { %v370_v7 = vrot.slane %v369_v6, 2 }
 0x210   : > { %v371_v8 = vadd.f32 %v370_v7, %v369_v6 }
 0x212   : > { %v372_v9 = vrot.slane %v371_v8, 1 }
 0x214   : > { %v373_v10 = vadd.f32 %v372_v9, %v371_v8 }
 0x216   : > { %v374_v11 = vsel %vm346_vm5, %v373_v10, 0.0 }
 0x217   : > { %375 = vadd.xlane.f32.xlu1 %v374_v11 }
 0x2a0   : > { %v376_v22 = vpop.xlane.xlu1 %375 }
 0x2a1   : > { %v377_v23 = vmul.f32 0.0009765625, %v376_v22 }
 0x2a3   : > { %v378_v25 = vadd.f32 1e-05, %v377_v23 }
 0x2a5   : > { %884 = vrsqrt.f32 %v378_v25 }
 0x2b2   : > { %v885_v28 = vpop.eup %884 }
 0x2b3   : > { %v380_v29 = vmul.f32 %v885_v28, %v1085_v39 }
 0x2b5   : > { %v384_v30 = vrot.slane %v380_v29, %v383_v26 }
 0x2b7   : > { %v385_v33 = vmul.f32 %v384_v30, %v361_v61  ;;  %v386_v34 = vmul.f32 %v384_v30, %v362_v62 }
 0x2b9   : > { %v391_v35 = vadd.f32 %v390_v31, %v385_v33  ;;  %v392_v36 = vadd.f32 %v390_v31, %v386_v34 }
 0x2bb   : > { %v802_v40 = vpack.c.bf16 %v391_v35, %v391_v35  ;;  %v803_v42 = vpack.c.bf16 %v392_v36, %v392_v36 }
 0x2bd   : > { %v417_v45 = vshrl.u32 %v802_v40, 16  ;;  %v425_v46 = vshrl.u32 %v803_v42, 16  ;;  %447 = vst.msk [vmem:[#allocation3 + $0x4] sm:$0xf] %vm409_vm6, %v802_v40  ;;  %448 = vst.msk [vmem:[#allocation3 + $0xc] sm:$0xf] %vm409_vm6, %v803_v42 }
 0x2be   : > { %v401_v47 = vrot.slane %v802_v40, 7  ;;  %v420_v49 = vshll.u32 %v802_v40, 16  ;;  %v428_v51 = vshll.u32 %v803_v42, 16  ;;  %v403_v53 = vrot.slane %v803_v42, 7 }
 0x2bf   : > { %v419_v48 = vrot.slane %v417_v45, 7  ;;  %v427_v50 = vrot.slane %v425_v46, 7 }
 0x2c0   : > { %408 = vst.msk [vmem:[#allocation3] sm:$0xe] %vm407_vm7, %v401_v47  ;;  %v402_v54 = vrot.slane %v401_v47, 4 }
 0x2c1   : > { %v422_v55 = vor.u32 %v420_v49, %v419_v48  ;;  %v423_v0 = vrot.slane %v419_v48, 4  ;;  %v430_v56 = vor.u32 %v428_v51, %v427_v50  ;;  %v643_v48 = vsub.s32 4, %v1079_v37 }
 0x2c2   : > { %v404_v57 = vsel %vm1058_vm14, %v402_v54, %v403_v53  ;;  %v649_v49 = vsub.s32 5, %v1079_v37 }
 0x2c3   : > { %432 = vrot.lane.b32.xlu0 %v422_v55, %s955_s30  ;;  %v431_v58 = vsel %vm1068_vm15, %v423_v0, %v430_v56  ;;  %410 = vst.msk [vmem:[#allocation3 + $0x8] sm:$0xf] %vm409_vm6, %v404_v57 }
 0x2c4   : > { %434 = vrot.lane.b32.xlu1 %v431_v58, %s955_s30  ;;  %v883_v24 = vld [vmem:[#allocation3 + $0x4] ss:$8 sps:$4 sm:$0xff]   ;;  %v650_v53 = vrot.slane %v1085_v39, %v649_v49 }
 0x2c5   : > { %791 = vmatprep.mubr.msk.bf16.mxu1 %vm346_vm5, %v883_v24 }
 0x2c7   : > { %v440_v17 = vld [vmem:[#allocation3] sm:$0xf] }
 0x2c8   : > { %658 = vrot.lane.b32.xlu1 %v656_v59, %s955_s30 }
 0x335   : > { %v433_v60 = vpop.permute.xlu0 %432 }
 0x336   : > { %v441_v61 = vsel %vm439_vm9, %v433_v60, %v440_v17  ;;  %v435_v62 = vpop.permute.xlu1 %434 }
 0x337   : > { %442 = vst [vmem:[#allocation3] sm:$0xf] %v441_v61  ;;  %444 = vst.msk [vmem:[#allocation3 + $0x8] sm:$0xf] %vm438_vm8, %v435_v62 }
 0x33a   : > { %v659_v22 = vpop.permute.xlu1 %658 }
 0x33b   : > { %v661_v23 = vadd.f32 %v659_v22, %v1088_v41  ;;  %v662_v43 = vadd.f32 %v659_v22, %v1091_v44 }
 0x33e   : > { %v881_v63 = vld [vmem:[#allocation3] ss:$8 sps:$4 sm:$0xff]  }
 0x33f   : > { %592 = vmatmul.mubr.bf16.vlgmr.msra.gmra.mxu1 %v881_v63 }
 0x3ff   : > { %v593_v3 = vpop.f32.mrf.mxu1 }
 0x400   : > { %v604_v4 = vadd.f32 %v603_v2, %v593_v3 }
 0x401   : > { %v595_v5 = vpop.f32.mrf.mxu1 }
 0x402   : > { %v606_v7 = vmax.f32 %v604_v4, 0.0 }
 0x403   : > { %v596_v6 = vpop.f32.mrf.mxu1 }
 0x404   : > { %v605_v8 = vadd.f32 %v603_v2, %v596_v6  ;;  %v608_v11 = vsel %vm346_vm5, %v606_v7, 0.0 }
 0x405   : > { %v598_v9 = vpop.f32.mrf.mxu1 }
 0x406   : > { %v607_v10 = vmax.f32 %v605_v8, 0.0 }
 0x408   : > { %v609_v12 = vsel %vm346_vm5, %v607_v10, 0.0 }
 0x409   : > { %v610_v13 = vadd.f32 %v609_v12, %v608_v11 }
 0x40b   : > { %v611_v14 = vrot.slane %v610_v13, 4 }
 0x40d   : > { %v612_v15 = vadd.f32 %v611_v14, %v610_v13 }
 0x40f   : > { %v613_v16 = vrot.slane %v612_v15, 2 }
 0x411   : > { %v614_v18 = vadd.f32 %v613_v16, %v612_v15 }
 0x413   : > { %v615_v19 = vrot.slane %v614_v18, 1 }
 0x415   : > { %v616_v20 = vadd.f32 %v615_v19, %v614_v18 }
 0x417   : > { %v617_v21 = vsel %vm346_vm5, %v616_v20, 0.0 }
 0x418   : > { %618 = vadd.xlane.f32.xlu0 %v617_v21 }
 0x42e   : > { %665 = vrot.lane.b32.xlu0 %v661_v23, %s955_s30 }
 0x4a1   : > { %v619_v25 = vpop.xlane.xlu0 %618 }
 0x4a2   : > { %v620_v26 = vmul.f32 0.0009765625, %v619_v25 }
 0x4a4   : > { %v621_v27 = vsub.f32 %v606_v7, %v620_v26  ;;  %v622_v28 = vsub.f32 %v607_v10, %v620_v26 }
 0x4a5   : > { %v666_v56 = vpop.permute.xlu0 %665 }
 0x4a6   : > { %v623_v29 = vmul.f32 %v621_v27, %v621_v27  ;;  %v624_v30 = vmul.f32 %v622_v28, %v622_v28 }
 0x4a8   : > { %v625_v31 = vsel %vm346_vm5, %v623_v29, 0.0  ;;  %v626_v32 = vsel %vm346_vm5, %v624_v30, 0.0 }
 0x4a9   : > { %v627_v33 = vadd.f32 %v626_v32, %v625_v31 }
 0x4ab   : > { %v628_v34 = vrot.slane %v627_v33, 4 }
 0x4ad   : > { %v629_v35 = vadd.f32 %v628_v34, %v627_v33 }
 0x4af   : > { %v630_v36 = vrot.slane %v629_v35, 2 }
 0x4b1   : > { %v631_v38 = vadd.f32 %v630_v36, %v629_v35 }
 0x4b3   : > { %v632_v40 = vrot.slane %v631_v38, 1 }
 0x4b5   : > { %v633_v41 = vadd.f32 %v632_v40, %v631_v38 }
 0x4b7   : > { %v634_v42 = vsel %vm346_vm5, %v633_v41, 0.0 }
 0x4b8   : > { %635 = vadd.xlane.f32.xlu1 %v634_v42 }
 0x4c9   : > { %667 = vrot.lane.b32.xlu1 %v662_v43, %s955_s30 }
 0x541   : > { %v636_v45 = vpop.xlane.xlu1 %635 }
 0x542   : > { %v637_v46 = vmul.f32 0.0009765625, %v636_v45 }
 0x544   : > { %v638_v47 = vadd.f32 1e-05, %v637_v46 }
 0x545   : > { %v668_v57 = vpop.permute.xlu1 %667 }
 0x546   : > { %886 = vrsqrt.f32 %v638_v47 }
 0x553   : > { %v887_v50 = vpop.eup %886 }
 0x554   : > { %v640_v51 = vmul.f32 %v887_v50, %v1085_v39 }
 0x556   : > { %v644_v52 = vrot.slane %v640_v51, %v643_v48 }
 0x558   : > { %v645_v44 = vmul.f32 %v644_v52, %v621_v27  ;;  %v646_v54 = vmul.f32 %v644_v52, %v622_v28 }
 0x55a   : > { %v651_v55 = vadd.f32 %v650_v53, %v645_v44  ;;  %v652_v0 = vadd.f32 %v650_v53, %v646_v54 }
 0x55c   : > { %v671_v58 = vadd.f32 %v666_v56, %v651_v55  ;;  %v672_v59 = vadd.f32 %v668_v57, %v652_v0 }
 0x55e   : > { %v673_v37 = vmax.f32 %v671_v58, 0.0  ;;  %v674_v60 = vmax.f32 %v672_v59, 0.0 }
 0x560   : > { %v804_v39 = vpack.c.bf16 %v673_v37, %v673_v37  ;;  %v805_v17 = vpack.c.bf16 %v674_v60, %v674_v60 }
 0x562   : > { %683 = vst.msk [vmem:[%s190_s7] sm:$0xf] %vm409_vm6, %v804_v39  ;;  %684 = vst.msk [vmem:[%s190_s7 + $0x4] sm:$0xf] %vm409_vm6, %v805_v17 }
 0x563   : > { %901 = shalt.err (!%p898_p3)
}
 0x564   : > { %s902_s23 = scalar_lea.hbm %s1188_s12, 128  ;;  %s906_s29 = scalar_lea.hbm %s1238_s4, 256 }
 0x565   : > { %p903_p4 = scmp.ne.s32.totalorder %s1188_s12, %s902_s23  ;;  %p907_p9 = scmp.lt.s32.totalorder %s1188_s12, %s1238_s4 }
 0x566   : > { %p908_p10 = scmp.lt.s32.totalorder %s906_s29, %s902_s23 }
 0x567   : > { %p904_p7 = pnand %p903_p4, %p1021_p5 }
 0x568   : > { %p909_p11 = por %p908_p10, %p907_p9 }
 0x569   : > { %p905_p8 = pneg %p904_p7 }
 0x56b   : > { %p910_p12 = pnand %p909_p11, %p905_p8 }
 0x56d   : > { %913 = shalt.err (!%p910_p12)
}
 0x56e   : > { %s957_s7 = smov 4  }
 0x56f   : > { %818 = dma.vmem_to_hbm [thread:$0]  (%p1021_p5), %s1183_s8, 128, %s1188_s12, %s1192_s13, %s955_s30, %s955_s30, %s957_s7  }
 0x570 PF: > { %p824_p13 = scmp.ge.s32.totalorder %s948_s18, 2  ;;  %s714_s9 = sand.u32 1, %s936_s15  }
 0x571   : > { %s715_s10 = scalar_lea.sflag [#allocation5], %s714_s9 }
 0x572   : > { %p821_p0 = pnand %p824_p13, %p1025_p6 }
 0x574   : > { %p822_p1 = pneg %p821_p0 }
 0x576   : > { %931 = dma.done.wait (%p822_p1), %s715_s10, 128  }
 0x577   : > { %933 = vsyncadd (%p822_p1), %s715_s10, 4294967168  ;;  %p14_p2 = scmp.ge.s32.totalorder %s1008_s21, 4   ;;  %s1249_s15 = smov %s940_s16 }
 0x578   : > { %s1250_s16 = smov %s944_s17  ;;  %s1251_s17 = smov %s1019_s24 }
 0x579   : > { %s1252_s18 = smov %s1008_s21  ;;  %16 = sbr.rel (!%p14_p2) target bundleno = 3 (0x3), region = 71 }
 0x57e   :  { %720 = vsyncpa [#allocation5], 1 }
 0x57f   :  { %722 = vsyncpa [#allocation5 + $0x1], 1 }

</bundles_post_ra>
